<compile_context>
chip_gen: v5e
topology: v5e:2x2
jax: 0.10.0
libtpu: 0.0.40
codegen_flags: <defaults>
</compile_context>

<pallas_src>
import functools
import math

import jax
import jax.numpy as jnp
from jax.experimental import pallas as pl
from jax.experimental.pallas import tpu as pltpu


def _grn_kernel(x_ref, gamma_ref, beta_ref, o_ref, *, channels):
    # x_ref: (Nb, HWF, CF)   gamma_ref/beta_ref: (1, CF)   CF = fold * channels
    # --- Reduction pass (f32): cast folded into the expression so no full
    #     f32 copy of the block stays live past the sum.
    xf = x_ref[...].astype(jnp.float32)
    sumsq = jnp.sum(xf * xf, axis=1, keepdims=True)          # (Nb, 1, CF)

    # Combine the `fold` lane groups (fold is a power of two) with XLU lane
    # rolls so every lane holds the full per-channel sum of squares.
    cf = sumsq.shape[-1]
    shift = cf // 2
    while shift >= channels:
        sumsq = sumsq + pltpu.roll(sumsq, shift=shift, axis=2)
        shift //= 2

    gx = jnp.sqrt(sumsq)                                      # per-channel L2, replicated
    # Each channel appears `fold` times identically -> mean over CF lanes
    # equals mean over the C true channels.
    denom = jnp.mean(gx, axis=-1, keepdims=True) + 1e-6       # (Nb, 1, 1)
    inv = pl.reciprocal(denom, approx=True)                   # EUP slot
    inv = inv * (2.0 - denom * inv)                           # Newton step -> f32 accuracy
    nx = gx * inv                                             # (Nb, 1, CF)

    gamma = gamma_ref[...].astype(jnp.float32)                # (1, CF)
    # Fused epilogue: y = x * (gamma*Nx + 1) + beta  -> 1 mul + 1 add / element.
    scale = (gamma * nx + 1.0).astype(o_ref.dtype)            # (Nb, 1, CF)
    beta = beta_ref[...].astype(o_ref.dtype)                  # (1, CF)

    # Re-read x in its native dtype for the epilogue (cheap vld; avoids holding
    # both x and its f32 widening across the reduction).
    x = x_ref[...]
    o_ref[...] = (x * scale + beta).astype(o_ref.dtype)


def _tpu_generation_info():
    """(physical VMEM bytes, has two TensorCores per chip)."""
    vmem_bytes = 128 * 1024 * 1024
    try:
        info = pltpu.get_tpu_info()
        v = getattr(info, "vmem_capacity_bytes", None)
        if v:
            vmem_bytes = int(v)
    except Exception:
        pass
    kind = ""
    try:
        kind = jax.devices()[0].device_kind.lower()
    except Exception:
        pass
    two_tc = ("v7" in kind) or (vmem_bytes <= 64 * 1024 * 1024)
    return vmem_bytes, two_tc


def _choose_fold(channels, hw, itemsize):
    """Lane-dense fold: CF = fold*C is a multiple of 128, fold a power of two.
    Prefer a fold that keeps HWF = HW/fold aligned to the sublane tile."""
    base = 128 // math.gcd(channels, 128)     # power of two
    if hw % base != 0:
        return 1                              # fallback: masked stores
    sublane = 8 if itemsize >= 4 else 16
    best = None
    f = base
    while f <= hw and f * channels <= 4096:   # cap CF at 32 vregs wide
        if hw % f == 0:
            hwf = hw // f
            if best is None:
                best = f
            if hwf % sublane == 0:
                best = f
                break
        f *= 2
    return best if best is not None else 1


def grn_pallas(x, gamma, beta):
    """x: (N, H, W, C); gamma, beta: (1, 1, 1, C)."""
    N, H, W, C = x.shape
    HW = H * W
    itemsize = x.dtype.itemsize

    # ---- Lane-dense folding (wrapper-side layout plumbing: free row-major views).
    fold = _choose_fold(C, HW, itemsize)
    CF = C * fold
    HWF = HW // fold
    x3 = x.reshape(N, HWF, CF)
    gamma2 = jnp.tile(gamma.reshape(1, C), (1, fold))   # lane j = r*C + c -> gamma[c]
    beta2 = jnp.tile(beta.reshape(1, C), (1, fold))

    # ---- Generation-aware block sizing.
    vmem_phys, two_tc = _tpu_generation_info()
    block_cap = (4 << 20) if two_tc else (8 << 20)      # bytes of x per block
    bytes_per_sample = HWF * CF * itemsize
    nb_cap = max(1, block_cap // bytes_per_sample)
    if two_tc:
        # >=4 grid steps so each of the 2 TensorCores gets >=2 steps to pipeline.
        nb_cap = min(nb_cap, max(1, N // 4))
    nb_cap = min(nb_cap, N)

    # Largest divisor of N <= nb_cap; if N is awkward (prime/odd), pad instead
    # of collapsing to many tiny steps.
    nb = 1
    for d in range(1, nb_cap + 1):
        if N % d == 0:
            nb = d
    pad = 0
    if nb < max(1, nb_cap // 2):
        nb = nb_cap
        pad = (-N) % nb
    Np = N + pad
    grid_n = Np // nb
    if pad:
        x3 = jnp.pad(x3, ((0, pad), (0, 0), (0, 0)))    # padded rows: gx = 0, benign

    # ---- VMEM budgeting: derive limit from actual need, pick buffering depth.
    in_block = nb * HWF * CF * itemsize
    out_block = in_block

    def _need(ib, ob):
        return ib * in_block + ob * out_block + 4 * CF * 4 + (1 << 20)

    budget = max((vmem_phys * 3) // 4, 16 << 20)
    if _need(2, 2) > budget:
        in_depth, out_depth = 1, 1          # oversized block: single-buffer
        vmem_need = _need(1, 1)
    elif _need(3, 2) <= budget:
        in_depth, out_depth = 3, None       # deeper input pipeline hides exposed copy
        vmem_need = _need(3, 2)
    else:
        in_depth, out_depth = None, None    # default double-buffering
        vmem_need = _need(2, 2)
    vmem_limit = int(min(max(2 * vmem_need, 32 << 20), budget))

    kernel = functools.partial(_grn_kernel, channels=C)

    def _call(ind, outd):
        in_kw = {} if ind is None else {"pipeline_mode": pl.Buffered(ind)}
        out_kw = {} if outd is None else {"pipeline_mode": pl.Buffered(outd)}
        return pl.pallas_call(
            kernel,
            out_shape=jax.ShapeDtypeStruct((Np, HWF, CF), x.dtype),
            grid_spec=pltpu.PrefetchScalarGridSpec(
                num_scalar_prefetch=0,
                grid=(grid_n,),
                in_specs=[
                    pl.BlockSpec((nb, HWF, CF), lambda i: (i, 0, 0), **in_kw),
                    pl.BlockSpec((1, CF), lambda i: (0, 0)),
                    pl.BlockSpec((1, CF), lambda i: (0, 0)),
                ],
                out_specs=pl.BlockSpec((nb, HWF, CF), lambda i: (i, 0, 0), **out_kw),
            ),
            compiler_params=pltpu.CompilerParams(
                dimension_semantics=("parallel",),
                vmem_limit_bytes=vmem_limit,
            ),
        )(x3, gamma2, beta2)

    if in_depth is None and out_depth is None:
        out3 = _call(None, None)
    else:
        try:
            out3 = _call(in_depth, out_depth)
        except Exception:
            # Fall back to default double-buffered specs if custom pipeline
            # depths are rejected by this JAX/Mosaic version.
            out3 = _call(None, None)

    if pad:
        out3 = out3[:N]
    return out3.reshape(N, H, W, C)


def grn_reference(x, gamma, beta):
    """Pure-JAX reference mirroring the PyTorch forward exactly."""
    xf = x.astype(jnp.float32)
    gx = jnp.sqrt(jnp.sum(xf * xf, axis=(1, 2), keepdims=True))    # (N,1,1,C)
    nx = gx / (jnp.mean(gx, axis=-1, keepdims=True) + 1e-6)        # (N,1,1,C)
    return (gamma.astype(jnp.float32) * (xf * nx)
            + beta.astype(jnp.float32) + xf).astype(x.dtype)


if __name__ == "__main__":
    key = jax.random.PRNGKey(0)
    kx, kg, kb = jax.random.split(key, 3)

    N, H, W, C = 2, 16, 16, 32                 # dim = C = 32
    x = jax.random.normal(kx, (N, H, W, C), dtype=jnp.float32)
    # Module __init__ uses zeros; use small deterministic random values here so
    # the gamma/beta terms actually exercise the kernel math.
    gamma = 0.1 * jax.random.normal(kg, (1, 1, 1, C), dtype=jnp.float32)
    beta = 0.1 * jax.random.normal(kb, (1, 1, 1, C), dtype=jnp.float32)

    out = grn_pallas(x, gamma, beta)
    jax.block_until_ready(out)

    ref = grn_reference(x, gamma, beta)
    assert out.shape == ref.shape == (N, H, W, C)
    assert jnp.allclose(out, ref, atol=1e-5, rtol=1e-5), \
        f"max abs err {jnp.max(jnp.abs(out - ref))}"

    print("KERNEL_OK")
</pallas_src>

<mosaic_0001>
module attributes {stable_mosaic.version = 11 : i64} {
  func.func @_grn_kernel(%arg0: i32, %arg1: memref<2x64x128xf32, #tpu.memory_space<vmem>>, %arg2: memref<1x128xf32, #tpu.memory_space<vmem>>, %arg3: memref<1x128xf32, #tpu.memory_space<vmem>>, %arg4: memref<2x64x128xf32, #tpu.memory_space<vmem>>) attributes {dimension_semantics = [#tpu.dimension_semantics<parallel>], iteration_bounds = array<i64: 1>, scalar_prefetch = 0 : i64, scratch_operands = 0 : i64, tpu.core_type = #tpu.core_type<tc>, window_params = [{transform_indices = @transform_0, window_bounds = array<i64: 2, 64, 128>}, {pipeline_mode = #tpu.pipeline_mode<synchronous>, transform_indices = @transform_1, window_bounds = array<i64: 1, 128>}, {pipeline_mode = #tpu.pipeline_mode<synchronous>, transform_indices = @transform_2, window_bounds = array<i64: 1, 128>}, {transform_indices = @transform_3, window_bounds = array<i64: 2, 64, 128>}]} {
    %c0 = arith.constant 0 : index
    %c0_0 = arith.constant 0 : index
    %c0_1 = arith.constant 0 : index
    %0 = vector.load %arg1[%c0, %c0_0, %c0_1] : memref<2x64x128xf32, #tpu.memory_space<vmem>>, vector<2x64x128xf32>
    %1 = arith.mulf %0, %0 : vector<2x64x128xf32>
    %cst = arith.constant dense<0.000000e+00> : vector<2x128xf32>
    %2 = vector.multi_reduction <add>, %1, %cst [1] : vector<2x64x128xf32> to vector<2x128xf32>
    %3 = vector.shape_cast %2 : vector<2x128xf32> to vector<2x1x128xf32>
    %c64_i32 = arith.constant 64 : i32
    %4 = tpu.dynamic_rotate %3 by %c64_i32 dim 2 : vector<2x1x128xf32>, i32 -> vector<2x1x128xf32>
    %5 = arith.addf %3, %4 : vector<2x1x128xf32>
    %c32_i32 = arith.constant 32 : i32
    %6 = tpu.dynamic_rotate %5 by %c32_i32 dim 2 : vector<2x1x128xf32>, i32 -> vector<2x1x128xf32>
    %7 = arith.addf %5, %6 : vector<2x1x128xf32>
    %8 = math.sqrt %7 : vector<2x1x128xf32>
    %cst_2 = arith.constant dense<0.000000e+00> : vector<2x1xf32>
    %9 = vector.multi_reduction <add>, %8, %cst_2 [2] : vector<2x1x128xf32> to vector<2x1xf32>
    %10 = vector.shape_cast %9 : vector<2x1xf32> to vector<2x1x1xf32>
    %cst_3 = arith.constant 1.280000e+02 : f32
    %11 = vector.broadcast %cst_3 : f32 to vector<2x1x1xf32>
    %12 = arith.divf %10, %11 : vector<2x1x1xf32>
    %cst_4 = arith.constant 9.99999997E-7 : f32
    %13 = vector.broadcast %cst_4 : f32 to vector<2x1x1xf32>
    %14 = arith.addf %12, %13 : vector<2x1x1xf32>
    %15 = tpu.reciprocal %14 {approx = true} : vector<2x1x1xf32> -> vector<2x1x1xf32>
    %16 = arith.mulf %14, %15 : vector<2x1x1xf32>
    %cst_5 = arith.constant 2.000000e+00 : f32
    %17 = vector.broadcast %cst_5 : f32 to vector<2x1x1xf32>
    %18 = arith.subf %17, %16 : vector<2x1x1xf32>
    %19 = arith.mulf %15, %18 : vector<2x1x1xf32>
    %20 = vector.broadcast %19 : vector<2x1x1xf32> to vector<2x1x128xf32>
    %21 = arith.mulf %8, %20 : vector<2x1x128xf32>
    %c0_6 = arith.constant 0 : index
    %c0_7 = arith.constant 0 : index
    %22 = vector.load %arg2[%c0_6, %c0_7] : memref<1x128xf32, #tpu.memory_space<vmem>>, vector<1x128xf32>
    %23 = vector.shape_cast %22 : vector<1x128xf32> to vector<1x1x128xf32>
    %24 = vector.broadcast %23 : vector<1x1x128xf32> to vector<2x1x128xf32>
    %25 = arith.mulf %24, %21 : vector<2x1x128xf32>
    %cst_8 = arith.constant 1.000000e+00 : f32
    %26 = vector.broadcast %cst_8 : f32 to vector<2x1x128xf32>
    %27 = arith.addf %25, %26 : vector<2x1x128xf32>
    %c0_9 = arith.constant 0 : index
    %c0_10 = arith.constant 0 : index
    %28 = vector.load %arg3[%c0_9, %c0_10] : memref<1x128xf32, #tpu.memory_space<vmem>>, vector<1x128xf32>
    %c0_11 = arith.constant 0 : index
    %c0_12 = arith.constant 0 : index
    %c0_13 = arith.constant 0 : index
    %29 = vector.load %arg1[%c0_11, %c0_12, %c0_13] : memref<2x64x128xf32, #tpu.memory_space<vmem>>, vector<2x64x128xf32>
    %30 = vector.broadcast %27 : vector<2x1x128xf32> to vector<2x64x128xf32>
    %31 = arith.mulf %29, %30 : vector<2x64x128xf32>
    %32 = vector.shape_cast %28 : vector<1x128xf32> to vector<1x1x128xf32>
    %33 = vector.broadcast %32 : vector<1x1x128xf32> to vector<2x64x128xf32>
    %34 = arith.addf %31, %33 : vector<2x64x128xf32>
    %c0_14 = arith.constant 0 : index
    %c0_15 = arith.constant 0 : index
    %c0_16 = arith.constant 0 : index
    %35 = vector.load %arg4[%c0_14, %c0_15, %c0_16] : memref<2x64x128xf32, #tpu.memory_space<vmem>>, vector<2x64x128xf32>
    tpu.vector_store %arg4[%c0_14, %c0_15, %c0_16], %34 {strides = array<i32>} : memref<2x64x128xf32, #tpu.memory_space<vmem>>, vector<2x64x128xf32>,
    return
  }
  func.func @transform_0(%arg0: i32) -> (i32, i32, i32) {
    %c0_i32 = arith.constant 0 : i32
    %c0_i32_0 = arith.constant 0 : i32
    %c0_i32_1 = arith.constant 0 : i32
    return %arg0, %c0_i32, %c0_i32_0 : i32, i32, i32
  }
  func.func @transform_1(%arg0: i32) -> (i32, i32) {
    %c0_i32 = arith.constant 0 : i32
    %c0_i32_0 = arith.constant 0 : i32
    %c0_i32_1 = arith.constant 0 : i32
    return %c0_i32, %c0_i32_0 : i32, i32
  }
  func.func @transform_2(%arg0: i32) -> (i32, i32) {
    %c0_i32 = arith.constant 0 : i32
    %c0_i32_0 = arith.constant 0 : i32
    %c0_i32_1 = arith.constant 0 : i32
    return %c0_i32, %c0_i32_0 : i32, i32
  }
  func.func @transform_3(%arg0: i32) -> (i32, i32, i32) {
    %c0_i32 = arith.constant 0 : i32
    %c0_i32_0 = arith.constant 0 : i32
    %c0_i32_1 = arith.constant 0 : i32
    return %arg0, %c0_i32, %c0_i32_0 : i32, i32, i32
  }
}

</mosaic_0001>

<bundles_post_ra>
// kernel: tpu_custom_call.1
= control target key start
LH: loop header
LB: loop body
LE: loop exit
PB: predicated region body
PF: predicated region fallthrough
CT: control target
= control target key end

     0   :  { %8 = vsyncpa [#allocation3], 0  ;;  %s473_s0 = inlined_call_operand.hbm [shape: f32[2,64,128], index: 0, kind: input, shape index: {}]   ;;  %s474_s1 = inlined_call_operand.hbm [shape: f32[1,128], index: 1, kind: input, shape index: {}]   ;;  %s475_s2 = inlined_call_operand.vmem [shape: f32[1,128], index: 2, kind: input, shape index: {}]   ;;  %s476_s3 = inlined_call_operand.hbm [shape: f32[2,64,128], index: 3, kind: output, shape index: {}]  }
   0x1   :  { %9 = vsyncpa [#allocation6], 0 }
   0x2   :  { %10 = vsyncpa [#allocation4], 0  ;;  %s15_s14 = sshll.u32 %s473_s0, 4  ;;  %s347_s15 = smov [#allocation2]   ;;  %s16_s14 = int_to_ptr.hbm [resolvable:$true] %s15_s14 }
   0x3   :  { %s17_s16 = sshll.u32 %s347_s15, 4  ;;  %s29_s19 = sshll.u32 %s474_s1, 4  ;;  %s18_s16 = int_to_ptr.vmem [resolvable:$true] %s17_s16  ;;  %s30_s19 = int_to_ptr.hbm [resolvable:$true] %s29_s19 }
   0x4   :  { %s348_s20 = smov 128   ;;  %s349_s21 = smov 8  }
   0x5   :  { %23 = dma.hbm_to_vmem [thread:$0]  %s16_s14, 2048, %s18_s16, [#allocation3], %s348_s20, %s348_s20, %s349_s21  }
   0x6   :  { %s350_s22 = smov [#allocation5]  }
   0x7   :  { %s31_s23 = sshll.u32 %s350_s22, 4  ;;  %s32_s23 = int_to_ptr.vmem [resolvable:$true] %s31_s23 }
   0x8   :  { %34 = dma.hbm_to_vmem [thread:$0]  %s30_s19, 16, %s32_s23, [#allocation6]  }
   0x9   :  { %341 = dma.done.wait [#allocation3], 2048  }
   0xa   :  { %342 = vsyncadd [#allocation3], 4294965248 }
   0xb   :  { %343 = dma.done.wait [#allocation6], 16  }
   0xc   :  { %344 = vsyncadd [#allocation6], 4294967280  ;;  %v384_v0 = vld [vmem:[#allocation2] sm:$0xff]  ;;  %v386_v1 = vld [vmem:[#allocation2 + $0x8] sm:$0xff]  ;;  %s351_s0 = smov 64   ;;  %s352_s1 = smov 32  }
   0xd   :  { %v388_v2 = vld [vmem:[#allocation2 + $0x10] sm:$0xff]  ;;  %v390_v3 = vld [vmem:[#allocation2 + $0x18] sm:$0xff]  ;;  %v61_v4 = vmul.f32 %v384_v0, %v384_v0  ;;  %v62_v5 = vmul.f32 %v386_v1, %v386_v1  ;;  %v398_v7 = vld [vmem:[#allocation2 + $0x20] sm:$0xff]  ;;  %vm139_vm1 = vcmask 1040384   ;;  %s236_s29 = sshll.u32 %s476_s3, 4  ;;  %s237_s29 = int_to_ptr.hbm [resolvable:$true] %s236_s29 }
   0xe   :  { %v63_v6 = vmul.f32 %v388_v2, %v388_v2  ;;  %v400_v8 = vld [vmem:[#allocation2 + $0x40] sm:$0xff]  ;;  %v64_v9 = vmul.f32 %v390_v3, %v390_v3  ;;  %v404_v11 = vld [vmem:[#allocation2 + $0x48] sm:$0xff]  ;;  %v406_v12 = vld [vmem:[#allocation2 + $0x50] sm:$0xff]  ;;  %v65_v18 = vmul.f32 %v398_v7, %v398_v7 }
   0xf   :  { %v77_v10 = vadd.f32 %v62_v5, %v61_v4  ;;  %v408_v13 = vld [vmem:[#allocation2 + $0x58] sm:$0xff]  ;;  %v69_v14 = vmul.f32 %v400_v8, %v400_v8  ;;  %v412_v15 = vld [vmem:[#allocation2 + $0x28] sm:$0xff]  ;;  %v70_v16 = vmul.f32 %v404_v11, %v404_v11  ;;  %v71_v17 = vmul.f32 %v406_v12, %v406_v12  ;;  %v420_v20 = vld [vmem:[#allocation2 + $0x60] sm:$0xff] }
  0x10   :  { %v422_v21 = vld [vmem:[#allocation2 + $0x30] sm:$0xff]  ;;  %v72_v22 = vmul.f32 %v408_v13, %v408_v13  ;;  %v66_v24 = vmul.f32 %v412_v15, %v412_v15  ;;  %v428_v26 = vld [vmem:[#allocation2 + $0x68] sm:$0xff]  ;;  %v430_v27 = vld [vmem:[#allocation2 + $0x38] sm:$0xff]  ;;  %v73_v28 = vmul.f32 %v420_v20, %v420_v20 }
  0x11   :  { %v78_v19 = vadd.f32 %v77_v10, %v63_v6  ;;  %v90_v23 = vadd.f32 %v70_v16, %v69_v14  ;;  %v67_v30 = vmul.f32 %v422_v21, %v422_v21  ;;  %v436_v32 = vld [vmem:[#allocation2 + $0x70] sm:$0xff]  ;;  %v74_v33 = vmul.f32 %v428_v26, %v428_v26  ;;  %v442_v37 = vld [vmem:[#allocation2 + $0x78] sm:$0xff] }
  0x12   :  { %v68_v35 = vmul.f32 %v430_v27, %v430_v27  ;;  %v75_v38 = vmul.f32 %v436_v32, %v436_v32  ;;  %v76_v41 = vmul.f32 %v442_v37, %v442_v37 }
  0x13   :  { %v79_v25 = vadd.f32 %v78_v19, %v64_v9  ;;  %v91_v29 = vadd.f32 %v90_v23, %v71_v17 }
  0x15   :  { %v80_v31 = vadd.f32 %v79_v25, %v65_v18  ;;  %v92_v34 = vadd.f32 %v91_v29, %v72_v22 }
  0x17   :  { %v81_v36 = vadd.f32 %v80_v31, %v66_v24  ;;  %v93_v39 = vadd.f32 %v92_v34, %v73_v28 }
  0x19   :  { %v82_v40 = vadd.f32 %v81_v36, %v67_v30  ;;  %v94_v42 = vadd.f32 %v93_v39, %v74_v33 }
  0x1b   :  { %v83_v43 = vadd.f32 %v82_v40, %v68_v35  ;;  %v95_v44 = vadd.f32 %v94_v42, %v75_v38  ;;  %v353_v40 = vmov 128.0  }
  0x1d   :  { %v84_v45 = vrot.slane %v83_v43, 4  ;;  %v96_v46 = vadd.f32 %v95_v44, %v76_v41 }
  0x1f   :  { %v85_v47 = vadd.f32 %v84_v45, %v83_v43  ;;  %v97_v48 = vrot.slane %v96_v46, 4 }
  0x21   :  { %v86_v49 = vrot.slane %v85_v47, 2  ;;  %v98_v50 = vadd.f32 %v97_v48, %v96_v46 }
  0x23   :  { %v87_v51 = vadd.f32 %v86_v49, %v85_v47  ;;  %v99_v52 = vrot.slane %v98_v50, 2 }
  0x25   :  { %v88_v53 = vrot.slane %v87_v51, 1  ;;  %v100_v54 = vadd.f32 %v99_v52, %v98_v50 }
  0x27   :  { %v89_v55 = vadd.f32 %v88_v53, %v87_v51  ;;  %v101_v56 = vrot.slane %v100_v54, 1 }
  0x29   :  { %103 = vrot.lane.b32.xlu0 %v89_v55, %s351_s0  ;;  %v102_v57 = vadd.f32 %v101_v56, %v100_v54 }
  0x31   :  { %105 = vrot.lane.b32.xlu0 %v102_v57, %s351_s0 }
  0x9b   :  { %v104_v58 = vpop.permute.xlu0 %103 }
  0x9c   :  { %v107_v59 = vadd.f32 %v104_v58, %v89_v55 }
  0x9e   :  { %109 = vrot.lane.b32.xlu1 %v107_v59, %s352_s1 }
  0xa3   :  { %v106_v60 = vpop.permute.xlu0 %105 }
  0xa4   :  { %v108_v61 = vadd.f32 %v106_v60, %v102_v57  ;;  %v167_v57 = vld [vmem:[#allocation5] sm:$0x1] }
  0xa6   :  { %111 = vrot.lane.b32.xlu1 %v108_v61, %s352_s1 }
 0x110   :  { %v110_v62 = vpop.permute.xlu1 %109 }
 0x111   :  { %v113_v63 = vadd.f32 %v110_v62, %v107_v59 }
 0x113   :  { %259 = vrsqrt.f32 %v113_v63  ;;  %vm122_vm0 = vcmp.eq.f32.partialorder %v113_v63, inf  ;;  %v125_v24 = vand.u32 2147483648, %v113_v63  ;;  %vm124_vm2 = vcmp.eq.f32.partialorder %v113_v63, 0.0 }
 0x118   :  { %v112_v4 = vpop.permute.xlu1 %111 }
 0x119   :  { %v260_v5 = vpop.eup %259  ;;  %v114_v6 = vadd.f32 %v112_v4, %v108_v61  ;;  %v258_v4 = vld [vmem:[%s475_s2] ss:$0 sm:$0xff]  ;;  %s354_s2 = smov [#allocation7]  }
 0x11a   :  { %v116_v9 = vmul.f32 %v260_v5, %v113_v63  ;;  %s234_s26 = sshll.u32 %s354_s2, 4  ;;  %s235_s26 = int_to_ptr.vmem [resolvable:$true] %s234_s26 }
 0x11b   :  { %261 = vrsqrt.f32 %v114_v6  ;;  %vm134_vm3 = vcmp.eq.f32.partialorder %v114_v6, inf  ;;  %v137_v35 = vand.u32 2147483648, %v114_v6  ;;  %vm136_vm4 = vcmp.eq.f32.partialorder %v114_v6, 0.0 }
 0x11c   :  { %v117_v10 = vmul.f32 %v260_v5, %v116_v9  ;;  %263 = vrcp.f32 %v353_v40 }
 0x11e   :  { %v118_v14 = vmul.f32 0.5, %v117_v10 }
 0x120   :  { %v119_v16 = vsub.f32 1.5, %v118_v14 }
 0x121   :  { %v262_v17 = vpop.eup %261 }
 0x122   :  { %v120_v18 = vmul.f32 %v260_v5, %v119_v16  ;;  %v128_v19 = vmul.f32 %v262_v17, %v114_v6  ;;  %v264_v41 = vpop.eup %263 }
 0x123   :  { %v147_v42 = vmul.f32 128.0, %v264_v41  ;;  %vm151_vm5 = vweird.f32 %v264_v41 }
 0x124   :  { %v121_v22 = vmul.f32 %v120_v18, %v113_v63  ;;  %v129_v23 = vmul.f32 %v262_v17, %v128_v19 }
 0x125   :  { %v148_v43 = vsub.f32 1.0, %v147_v42 }
 0x126   :  { %v123_v25 = vsel %vm122_vm0, %v113_v63, %v121_v22  ;;  %v130_v28 = vmul.f32 0.5, %v129_v23 }
 0x127   :  { %v126_v29 = vsel %vm124_vm2, %v125_v24, %v123_v25  ;;  %v149_v44 = vmul.f32 %v264_v41, %v148_v43 }
 0x128   :  { %v140_v30 = vsel %vm139_vm1, %v126_v29, 0.0  ;;  %v131_v31 = vsub.f32 1.5, %v130_v28 }
 0x129   :  { %141 = vadd.xlane.f32.xlu2 %v140_v30  ;;  %v150_v45 = vadd.f32 %v264_v41, %v149_v44 }
 0x12a   :  { %v132_v33 = vmul.f32 %v262_v17, %v131_v31 }
 0x12b   :  { %v152_v46 = vsel %vm151_vm5, %v264_v41, %v150_v45 }
 0x12c   :  { %v133_v34 = vmul.f32 %v132_v33, %v114_v6 }
 0x12e   :  { %v135_v36 = vsel %vm134_vm3, %v114_v6, %v133_v34 }
 0x12f   :  { %v138_v38 = vsel %vm136_vm4, %v137_v35, %v135_v36 }
 0x130   :  { %v143_v39 = vsel %vm139_vm1, %v138_v38, 0.0 }
 0x131   :  { %144 = vadd.xlane.f32.xlu2 %v143_v39 }
 0x19c   :  { %v142_v47 = vpop.xlane.xlu2 %141 }
 0x19d   :  { %v153_v48 = vmul.f32 %v152_v46, %v142_v47 }
 0x19f   :  { %v155_v49 = vadd.f32 1e-06, %v153_v48 }
 0x1a1   :  { %265 = vrcp.f32 %v155_v49 }
 0x1a4   :  { %v145_v50 = vpop.xlane.xlu2 %144 }
 0x1a5   :  { %v154_v51 = vmul.f32 %v152_v46, %v145_v50 }
 0x1a7   :  { %v266_v52 = vpop.eup %265  ;;  %v156_v53 = vadd.f32 1e-06, %v154_v51 }
 0x1a8   :  { %v159_v54 = vmul.f32 %v266_v52, %v155_v49 }
 0x1a9   :  { %267 = vrcp.f32 %v156_v53 }
 0x1aa   :  { %v161_v55 = vsub.f32 2.0, %v159_v54 }
 0x1ac   :  { %v163_v56 = vmul.f32 %v266_v52, %v161_v55 }
 0x1ae   :  { %v165_v58 = vmul.f32 %v163_v56, %v126_v29 }
 0x1af   :  { %v268_v59 = vpop.eup %267 }
 0x1b0   :  { %v168_v60 = vmul.f32 %v167_v57, %v165_v58  ;;  %v160_v61 = vmul.f32 %v268_v59, %v156_v53 }
 0x1b2   :  { %v170_v62 = vadd.f32 1.0, %v168_v60  ;;  %v162_v63 = vsub.f32 2.0, %v160_v61 }
 0x1b4   :  { %v175_v5 = vperm.slane %v170_v62, 0  ;;  %v164_v6 = vmul.f32 %v268_v59, %v162_v63 }
 0x1b6   :  { %v179_v9 = vmul.f32 %v175_v5, %v384_v0  ;;  %v180_v10 = vmul.f32 %v175_v5, %v386_v1  ;;  %v181_v14 = vmul.f32 %v175_v5, %v388_v2  ;;  %v182_v16 = vmul.f32 %v175_v5, %v390_v3 }
 0x1b7   :  { %v183_v17 = vmul.f32 %v175_v5, %v398_v7  ;;  %v184_v18 = vmul.f32 %v175_v5, %v412_v15  ;;  %v185_v19 = vmul.f32 %v175_v5, %v422_v21  ;;  %v186_v25 = vmul.f32 %v175_v5, %v430_v27 }
 0x1b8   :  { %v198_v22 = vadd.f32 %v258_v4, %v179_v9  ;;  %v199_v23 = vadd.f32 %v258_v4, %v180_v10  ;;  %v200_v24 = vadd.f32 %v258_v4, %v181_v14  ;;  %v201_v28 = vadd.f32 %v258_v4, %v182_v16 }
 0x1b9   :  { %v202_v29 = vadd.f32 %v258_v4, %v183_v17  ;;  %v166_v0 = vmul.f32 %v164_v6, %v138_v38  ;;  %v203_v1 = vadd.f32 %v258_v4, %v184_v18  ;;  %v204_v2 = vadd.f32 %v258_v4, %v185_v19 }
 0x1ba   :  { %214 = vst [vmem:[#allocation7] sm:$0xff] %v198_v22  ;;  %v205_v30 = vadd.f32 %v258_v4, %v186_v25 }
 0x1bb   :  { %215 = vst [vmem:[#allocation7 + $0x8] sm:$0xff] %v199_v23  ;;  %v169_v3 = vmul.f32 %v167_v57, %v166_v0 }
 0x1bc   :  { %216 = vst [vmem:[#allocation7 + $0x10] sm:$0xff] %v200_v24 }
 0x1bd   :  { %217 = vst [vmem:[#allocation7 + $0x18] sm:$0xff] %v201_v28  ;;  %v171_v7 = vadd.f32 1.0, %v169_v3 }
 0x1be   :  { %218 = vst [vmem:[#allocation7 + $0x20] sm:$0xff] %v202_v29 }
 0x1bf   :  { %219 = vst [vmem:[#allocation7 + $0x28] sm:$0xff] %v203_v1  ;;  %v176_v15 = vperm.slane %v171_v7, 0 }
 0x1c0   :  { %220 = vst [vmem:[#allocation7 + $0x30] sm:$0xff] %v204_v2 }
 0x1c1   :  { %221 = vst [vmem:[#allocation7 + $0x38] sm:$0xff] %v205_v30  ;;  %v187_v21 = vmul.f32 %v176_v15, %v400_v8  ;;  %v188_v27 = vmul.f32 %v176_v15, %v404_v11  ;;  %v189_v31 = vmul.f32 %v176_v15, %v406_v12  ;;  %v190_v33 = vmul.f32 %v176_v15, %v408_v13 }
 0x1c2   :  { %v191_v34 = vmul.f32 %v176_v15, %v420_v20  ;;  %v192_v35 = vmul.f32 %v176_v15, %v428_v26  ;;  %v193_v36 = vmul.f32 %v176_v15, %v436_v32  ;;  %v194_v41 = vmul.f32 %v176_v15, %v442_v37 }
 0x1c3   :  { %v206_v38 = vadd.f32 %v258_v4, %v187_v21  ;;  %v207_v39 = vadd.f32 %v258_v4, %v188_v27  ;;  %v208_v40 = vadd.f32 %v258_v4, %v189_v31  ;;  %v209_v42 = vadd.f32 %v258_v4, %v190_v33 }
 0x1c4   :  { %v210_v43 = vadd.f32 %v258_v4, %v191_v34  ;;  %v211_v8 = vadd.f32 %v258_v4, %v192_v35  ;;  %v212_v11 = vadd.f32 %v258_v4, %v193_v36  ;;  %v213_v12 = vadd.f32 %v258_v4, %v194_v41 }
 0x1c5   :  { %222 = vst [vmem:[#allocation7 + $0x40] sm:$0xff] %v206_v38 }
 0x1c6   :  { %223 = vst [vmem:[#allocation7 + $0x48] sm:$0xff] %v207_v39 }
 0x1c7   :  { %224 = vst [vmem:[#allocation7 + $0x50] sm:$0xff] %v208_v40 }
 0x1c8   :  { %225 = vst [vmem:[#allocation7 + $0x58] sm:$0xff] %v209_v42 }
 0x1c9   :  { %226 = vst [vmem:[#allocation7 + $0x60] sm:$0xff] %v210_v43 }
 0x1ca   :  { %227 = vst [vmem:[#allocation7 + $0x68] sm:$0xff] %v211_v8 }
 0x1cb   :  { %228 = vst [vmem:[#allocation7 + $0x70] sm:$0xff] %v212_v11 }
 0x1cc   :  { %229 = vst [vmem:[#allocation7 + $0x78] sm:$0xff] %v213_v12 }
 0x1cd   :  { %242 = dma.vmem_to_hbm [thread:$0]  %s235_s26, 2048, %s237_s29, [#allocation4], %s348_s20, %s348_s20, %s349_s21  }
 0x1ce   :  { %345 = dma.done.wait [#allocation4], 2048  }
 0x1cf   :  { %346 = vsyncadd [#allocation4], 4294965248 }
 0x1d0   :  { %247 = vsyncpa [#allocation3], 1 }
 0x1d1   :  { %248 = vsyncpa [#allocation6], 1 }
 0x1d2   :  { %249 = vsyncpa [#allocation4], 1 }

</bundles_post_ra>
